<compile_context>
chip_gen: v7x
topology: tpu7x:2x2x1
jax: 0.10.0
libtpu: 0.0.40
codegen_flags: <defaults>
</compile_context>

<pallas_src>
import jax
import jax.numpy as jnp
from jax.experimental import pallas as pl
from jax.experimental.pallas import tpu as pltpu

IN_FEATURES = 7
IN_PAD = 8                                   # 7 features + 1 bias ("ones") column
OUT_FEATURES = 2
SAMPLES_PER_ROW = 16                         # 16 * IN_PAD = 128 lanes (one vreg row)
PACKED_IN = SAMPLES_PER_ROW * IN_PAD         # 128
PACKED_OUT = SAMPLES_PER_ROW * OUT_FEATURES  # 32


def _round_up(n: int, m: int) -> int:
    return ((n + m - 1) // m) * m


def _cdiv(n: int, m: int) -> int:
    return (n + m - 1) // m


def _packed_affine_kernel(x_ref, w_ref, o_ref):
    """(rb, 128) lane-packed samples @ (128, 32) block-diagonal folded weight."""
    o_ref[...] = jnp.dot(
        x_ref[...],
        w_ref[...],
        preferred_element_type=jnp.float32,
        precision=jax.lax.Precision.HIGHEST,
    ).astype(o_ref.dtype)


def fold_params(params):
    """Collapse lin1/lin2/lin3 (+ all biases) into one (8, 2) affine block.

    Exact in real arithmetic (no activations).  Row 7 carries the folded bias;
    the packed input has a matching "ones" column.
    """
    hp = jax.lax.Precision.HIGHEST
    w1, b1 = params["w1"], params["b1"]          # (7, 256), (1, 256)
    w2, b2 = params["w2"], params["b2"]          # (256, 64), (1, 64)
    w3, b3 = params["w3"], params["b3"]          # (64, 2),  (1, 2)

    w23 = jnp.dot(w2, w3, precision=hp)                                   # (256, 2)
    w = jnp.dot(w1, w23, precision=hp)                                    # (7, 2)
    b = jnp.dot(b1, w23, precision=hp) + jnp.dot(b2, w3, precision=hp) + b3  # (1, 2)
    return jnp.concatenate([w, b.reshape(1, OUT_FEATURES)], axis=0)       # (8, 2)


def _pack_weight(w_fold):
    """(8, 2) -> (128, 32) block-diagonal: 16 independent samples per lane row."""
    eye = jnp.eye(SAMPLES_PER_ROW, dtype=w_fold.dtype)
    # out[8*s + f, 2*t + c] = eye[s, t] * w_fold[f, c]
    return jnp.einsum("st,fc->sftc", eye, w_fold).reshape(PACKED_IN, PACKED_OUT)


def net_forward(x, params, *, tile_rows=2048):
    """x: (B, 7) float32 -> (B, 2) float32.  Same math as Net.forward."""
    B, F = x.shape
    assert F == IN_FEATURES, f"expected {IN_FEATURES} input features, got {F}"

    w_packed = _pack_weight(fold_params(params))

    rows = _cdiv(B, SAMPLES_PER_ROW)                         # packed rows needed
    rb = max(8, min(_round_up(tile_rows, 8), _round_up(rows, 8)))
    rows_pad = _round_up(rows, rb)
    b_pad = rows_pad * SAMPLES_PER_ROW

    # Single fused pack pass: the ones-fill supplies the bias column (col 7)
    # and harmless padding rows (their outputs are sliced away).  The reshape
    # to (rows_pad, 128) is a free row-major view.
    x_pad = jnp.ones((b_pad, IN_PAD), x.dtype).at[:B, :IN_FEATURES].set(x)
    x_packed = x_pad.reshape(rows_pad, PACKED_IN)

    out = pl.pallas_call(
        _packed_affine_kernel,
        out_shape=jax.ShapeDtypeStruct((rows_pad, PACKED_OUT), jnp.float32),
        grid_spec=pltpu.PrefetchScalarGridSpec(
            num_scalar_prefetch=0,
            grid=(rows_pad // rb,),
            in_specs=[
                # Packed x: streamed over the batch grid (auto double-buffered DMA),
                # lane-dense (128 useful lanes per vreg row).
                pl.BlockSpec((rb, PACKED_IN), lambda i: (i, 0)),
                # Packed folded weight: constant index_map -> VMEM-resident.
                pl.BlockSpec((PACKED_IN, PACKED_OUT), lambda i: (0, 0)),
            ],
            # Lane-packed output slab; 32 == full last dim of out_shape.
            out_specs=pl.BlockSpec((rb, PACKED_OUT), lambda i: (i, 0)),
        ),
        compiler_params=pltpu.CompilerParams(
            dimension_semantics=("parallel",),
        ),
    )(x_packed, w_packed)

    # Free row-major view back to per-sample layout, then drop padded rows.
    return out.reshape(b_pad, OUT_FEATURES)[:B]


def init_params(key):
    """Deterministic parameter init (shapes match the nn.Linear layers in Net)."""
    ks = jax.random.split(key, 6)

    def linear(kw, kb, fan_in, fan_out):
        # Mimic PyTorch's default uniform(-1/sqrt(fan_in), 1/sqrt(fan_in)).
        bound = 1.0 / jnp.sqrt(float(fan_in))
        w = jax.random.uniform(kw, (fan_in, fan_out), jnp.float32, -bound, bound)
        b = jax.random.uniform(kb, (1, fan_out), jnp.float32, -bound, bound)
        return w, b

    w1, b1 = linear(ks[0], ks[1], 7, 256)
    w2, b2 = linear(ks[2], ks[3], 256, 64)
    w3, b3 = linear(ks[4], ks[5], 64, 2)
    return {"w1": w1, "b1": b1, "w2": w2, "b2": b2, "w3": w3, "b3": b3}


if __name__ == "__main__":
    key = jax.random.PRNGKey(0)
    k_params, k_x = jax.random.split(key)
    params = init_params(k_params)

    def ref_forward(x):
        # The original 3-layer forward in plain JAX at HIGHEST matmul precision
        # (true f32 math) as the correctness reference.
        hp = jax.lax.Precision.HIGHEST
        h1 = jnp.dot(x, params["w1"], precision=hp) + params["b1"]
        h2 = jnp.dot(h1, params["w2"], precision=hp) + params["b2"]
        return jnp.dot(h2, params["w3"], precision=hp) + params["b3"]

    # Small batch: single grid step, packing pad 64 -> 128 samples.
    x_small = jax.random.normal(k_x, (64, IN_FEATURES), dtype=jnp.float32)
    out_small = jax.block_until_ready(net_forward(x_small, params))
    assert out_small.shape == (64, OUT_FEATURES)
    # Kernel matmul is HIGHEST precision; only the (exact-in-real-arithmetic)
    # fold reassociates the sum -> tight f32-level tolerance.
    assert jnp.allclose(out_small, ref_forward(x_small), atol=1e-4, rtol=1e-4)

    # Non-multiple batch exercises multi-tile grid + row padding + final slice.
    x_big = jax.random.normal(jax.random.PRNGKey(1), (1000, IN_FEATURES),
                              dtype=jnp.float32)
    out_big = jax.block_until_ready(net_forward(x_big, params, tile_rows=16))
    assert out_big.shape == (1000, OUT_FEATURES)
    assert jnp.allclose(out_big, ref_forward(x_big), atol=1e-4, rtol=1e-4)

    print("KERNEL_OK")
</pallas_src>

<mosaic_0001>
module attributes {stable_mosaic.version = 11 : i64} {
  func.func @_packed_affine_kernel(%arg0: i32, %arg1: memref<8x128xf32, #tpu.memory_space<vmem>>, %arg2: memref<128x32xf32, #tpu.memory_space<vmem>>, %arg3: memref<8x32xf32, #tpu.memory_space<vmem>>) attributes {dimension_semantics = [#tpu.dimension_semantics<parallel>], iteration_bounds = array<i64: 1>, scalar_prefetch = 0 : i64, scratch_operands = 0 : i64, tpu.core_type = #tpu.core_type<tc>, window_params = [{transform_indices = @transform_0, window_bounds = array<i64: 8, 128>}, {pipeline_mode = #tpu.pipeline_mode<synchronous>, transform_indices = @transform_1, window_bounds = array<i64: 128, 32>}, {transform_indices = @transform_2, window_bounds = array<i64: 8, 32>}]} {
    %c0 = arith.constant 0 : index
    %c0_0 = arith.constant 0 : index
    %0 = vector.load %arg1[%c0, %c0_0] : memref<8x128xf32, #tpu.memory_space<vmem>>, vector<8x128xf32>
    %c0_1 = arith.constant 0 : index
    %c0_2 = arith.constant 0 : index
    %1 = vector.load %arg2[%c0_1, %c0_2] : memref<128x32xf32, #tpu.memory_space<vmem>>, vector<128x32xf32>
    %cst = arith.constant dense<0.000000e+00> : vector<8x32xf32>
    %2 = tpu.matmul %0, %1, %cst {dimension_numbers = #tpu.dot_dimension_numbers<[1], [0], [0], [1], [0, 0, 1, 1], [], []>, precision = #tpu.contract_precision<fp32>} : vector<8x128xf32>, vector<128x32xf32>, vector<8x32xf32> -> vector<8x32xf32>
    %c0_3 = arith.constant 0 : index
    %c0_4 = arith.constant 0 : index
    %3 = vector.load %arg3[%c0_3, %c0_4] : memref<8x32xf32, #tpu.memory_space<vmem>>, vector<8x32xf32>
    tpu.vector_store %arg3[%c0_3, %c0_4], %2 {strides = array<i32>} : memref<8x32xf32, #tpu.memory_space<vmem>>, vector<8x32xf32>,
    return
  }
  func.func @transform_0(%arg0: i32) -> (i32, i32) {
    %c0_i32 = arith.constant 0 : i32
    %c0_i32_0 = arith.constant 0 : i32
    return %arg0, %c0_i32 : i32, i32
  }
  func.func @transform_1(%arg0: i32) -> (i32, i32) {
    %c0_i32 = arith.constant 0 : i32
    %c0_i32_0 = arith.constant 0 : i32
    %c0_i32_1 = arith.constant 0 : i32
    return %c0_i32, %c0_i32_0 : i32, i32
  }
  func.func @transform_2(%arg0: i32) -> (i32, i32) {
    %c0_i32 = arith.constant 0 : i32
    %c0_i32_0 = arith.constant 0 : i32
    return %arg0, %c0_i32 : i32, i32
  }
}

</mosaic_0001>

<bundles_post_ra>
// kernel: tpu_custom_call.1
= control target key start
LH: loop header
LB: loop body
LE: loop exit
PB: predicated region body
PF: predicated region fallthrough
CT: control target
= control target key end

     0   :  { %v1179_v3 = vmov 0.0|0.0   ;;  %vm1180_vm0 = vmmov 0   ;;  %v1181_v11 = vmov 0.0   ;;  %s1508_s0 = inlined_call_operand.vmem [shape: f32[8,128], index: 0, kind: input, shape index: {}]   ;;  %s1509_s1 = inlined_call_operand.vmem [shape: f32[128,32], index: 1, kind: input, shape index: {}]   ;;  %s1510_s2 = inlined_call_operand.hbm [shape: f32[8,32], index: 2, kind: output, shape index: {}]  }
   0x1   :  { %v13_v0 = vld [vmem:[%s1509_s1] sm:$0xff]  ;;  %v14_v1 = vld [vmem:[%s1509_s1 + $0x8] sm:$0xff]  ;;  %v15_v2 = vld [vmem:[%s1509_s1 + $0x10] sm:$0xff]  ;;  %998 = vmatprep.subr.bf16.mxu1 %v1179_v3  ;;  %1070 = vmatprep.subr.bf16.mxu0 %v1179_v3 }
   0x2   :  { %v30_v4 = vand.u32 4294901760, %v13_v0  ;;  %v33_v5 = vand.u32 4294901760, %v14_v1  ;;  %v16_v6 = vld [vmem:[%s1509_s1 + $0x18] sm:$0xff]  ;;  %v36_v7 = vand.u32 4294901760, %v15_v2  ;;  %v17_v9 = vld [vmem:[%s1509_s1 + $0x20] sm:$0xff]  ;;  %v18_v10 = vld [vmem:[%s1509_s1 + $0x28] sm:$0xff]  ;;  %820 = vmatprep.mubr.msk.f32.mxu1 %vm1180_vm0, %v1181_v11  ;;  %925 = vmatprep.mubr.msk.f32.mxu0 %vm1180_vm0, %v1181_v11 }
   0x3   :  { %v39_v8 = vand.u32 4294901760, %v16_v6  ;;  %v42_v14 = vand.u32 4294901760, %v17_v9  ;;  %v45_v15 = vand.u32 4294901760, %v18_v10  ;;  %v19_v16 = vld [vmem:[%s1509_s1 + $0x30] sm:$0xff]  ;;  %v20_v17 = vld [vmem:[%s1509_s1 + $0x38] sm:$0xff] }
   0x4   :  { %v1222_v12 = vpack.c.bf16 %v33_v5, %v30_v4 }
   0x5   :  { %v1226_v13 = vpack.c.bf16 %v39_v8, %v36_v7 }
   0x6   :  { %1000 = vmatpush3.bf16.msra.mxu1 %v1222_v12  ;;  %1072 = vmatpush3.bf16.msra.mxu0 %v1222_v12 }
   0x7   :  { %1001 = vmatprep.subr.bf16.mxu1 %v1179_v3  ;;  %1073 = vmatprep.subr.bf16.mxu0 %v1179_v3 }
   0x8   :  { %7 = vsyncpa [#allocation3], 0  ;;  %v1238_v18 = vpack.c.bf16 %v45_v15, %v42_v14  ;;  %v48_v19 = vand.u32 4294901760, %v19_v16  ;;  %v51_v20 = vand.u32 4294901760, %v20_v17  ;;  %v1245_v21 = vld [vmem:[%s1509_s1 + $0x40] sm:$0xff]  ;;  %v1250_v22 = vld [vmem:[%s1509_s1 + $0x48] sm:$0xff]  ;;  %v1273_v29 = vsub.f32 %v13_v0, %v30_v4 }
   0x9   :  { %v54_v24 = vand.u32 4294901760, %v1245_v21  ;;  %v57_v25 = vand.u32 4294901760, %v1250_v22  ;;  %v12_v26 = vld [vmem:[%s1508_s0] sm:$0xff]  ;;  %v1266_v27 = vld [vmem:[%s1509_s1 + $0x50] sm:$0xff]  ;;  %v1271_v28 = vld [vmem:[%s1509_s1 + $0x58] sm:$0xff]  ;;  %v1277_v31 = vsub.f32 %v14_v1, %v33_v5  ;;  %v1297_v37 = vsub.f32 %v15_v2, %v36_v7 }
   0xa   :  { %1003 = vmatpush3.bf16.msra.mxu1 %v1226_v13  ;;  %1075 = vmatpush3.bf16.msra.mxu0 %v1226_v13  ;;  %v1254_v23 = vpack.c.bf16 %v51_v20, %v48_v19  ;;  %v1275_v30 = vand.u32 4294901760, %v12_v26  ;;  %v60_v33 = vand.u32 4294901760, %v1266_v27  ;;  %v63_v34 = vand.u32 4294901760, %v1271_v28  ;;  %v1288_v35 = vld [vmem:[%s1509_s1 + $0x60] sm:$0xff]  ;;  %v1295_v36 = vld [vmem:[%s1509_s1 + $0x68] sm:$0xff]  ;;  %v1317_v43 = vld [vmem:[%s1509_s1 + $0x70] sm:$0xff] }
   0xb   :  { %1004 = vmatprep.subr.bf16.mxu1 %v1179_v3  ;;  %1076 = vmatprep.subr.bf16.mxu0 %v1179_v3  ;;  %v1281_v32 = vpack.c.bf16 %v57_v25, %v54_v24  ;;  %v1299_v38 = vsub.f32 %v16_v6, %v39_v8  ;;  %v66_v39 = vand.u32 4294901760, %v1288_v35  ;;  %v69_v42 = vand.u32 4294901760, %v1295_v36  ;;  %v1322_v44 = vld [vmem:[%s1509_s1 + $0x78] sm:$0xff]  ;;  %s1182_s1 = smov [#allocation2]  }
   0xc   :  { %v1303_v40 = vsub.f32 %v12_v26, %v1275_v30  ;;  %v1311_v41 = vpack.c.bf16 %v63_v34, %v60_v33  ;;  %v123_v45 = vand.u32 4294901760, %v1273_v29  ;;  %v130_v46 = vand.u32 4294901760, %v1277_v31  ;;  %s678_s14 = sshll.u32 %s1182_s1, 4  ;;  %s679_s14 = int_to_ptr.vmem [resolvable:$true] %s678_s14 }
   0xd   :  { %v1328_v47 = vsub.f32 %v17_v9, %v42_v14  ;;  %v1330_v48 = vsub.f32 %v18_v10, %v45_v15  ;;  %v72_v49 = vand.u32 4294901760, %v1317_v43  ;;  %v75_v50 = vand.u32 4294901760, %v1322_v44  ;;  %s1155_s15 = scalar_lea.vmem %s679_s14, 128  ;;  %p1160_p1 = scmp.lt.s32.totalorder %s679_s14, %s679_s14 }
   0xe   :  { %1006 = vmatpush3.bf16.msra.mxu1 %v1238_v18  ;;  %1078 = vmatpush3.bf16.msra.mxu0 %v1238_v18  ;;  %v112_v51 = vand.u32 4294901760, %v1303_v40  ;;  %v137_v52 = vand.u32 4294901760, %v1297_v37  ;;  %v1342_v53 = vpack.c.bf16 %v69_v42, %v66_v39  ;;  %v124_v54 = vsub.f32 %v1273_v29, %v123_v45  ;;  %p1156_p0 = scmp.ne.s32.totalorder %s679_s14, %s1155_s15  ;;  %p1161_p2 = scmp.lt.s32.totalorder %s1155_s15, %s1155_s15 }
   0xf   :  { %1007 = vmatprep.subr.bf16.mxu1 %v1179_v3  ;;  %1079 = vmatprep.subr.bf16.mxu0 %v1179_v3  ;;  %v131_v55 = vsub.f32 %v1277_v31, %v130_v46  ;;  %v144_v56 = vand.u32 4294901760, %v1299_v38  ;;  %v1349_v57 = vsub.f32 %v19_v16, %v48_v19  ;;  %v1351_v58 = vsub.f32 %v20_v17, %v51_v20 }
  0x10   :  { %v113_v59 = vsub.f32 %v1303_v40, %v112_v51  ;;  %v138_v60 = vsub.f32 %v1297_v37, %v137_v52  ;;  %v151_v61 = vand.u32 4294901760, %v1328_v47  ;;  %v158_v62 = vand.u32 4294901760, %v1330_v48  ;;  %p1162_p3 = por %p1161_p2, %p1160_p1 }
  0x11   :  { %v1363_v63 = vpack.c.bf16 %v75_v50, %v72_v49  ;;  %v125_v0 = vand.u32 4294901760, %v124_v54  ;;  %v132_v1 = vand.u32 4294901760, %v131_v55  ;;  %v145_v2 = vsub.f32 %v1299_v38, %v144_v56 }
  0x12   :  { %1009 = vmatpush3.bf16.msra.mxu1 %v1254_v23  ;;  %1081 = vmatpush3.bf16.msra.mxu0 %v1254_v23  ;;  %v1369_v4 = vsub.f32 %v1245_v21, %v54_v24  ;;  %v1372_v5 = vsub.f32 %v1250_v22, %v57_v25  ;;  %v1095_v6 = vpack.c.bf16 %v130_v46, %v123_v45  ;;  %v114_v7 = vand.u32 4294901760, %v113_v59  ;;  %p1163_p4 = pnand %p1162_p3, %p1156_p0 }
  0x13   :  { %1010 = vmatprep.subr.bf16.mxu1 %v1179_v3  ;;  %1082 = vmatprep.subr.bf16.mxu0 %v1179_v3  ;;  %v139_v8 = vand.u32 4294901760, %v138_v60  ;;  %v152_v9 = vsub.f32 %v1328_v47, %v151_v61  ;;  %v159_v10 = vsub.f32 %v1330_v48, %v158_v62  ;;  %v1023_v14 = vpack.c.bf16 %v132_v1, %v125_v0 }
  0x14   :  { %v146_v15 = vand.u32 4294901760, %v145_v2  ;;  %v165_v16 = vand.u32 4294901760, %v1349_v57  ;;  %v172_v17 = vand.u32 4294901760, %v1351_v58  ;;  %v1385_v19 = vsub.f32 %v1266_v27, %v60_v33 }
  0x15   :  { %v1390_v20 = vsub.f32 %v1271_v28, %v63_v34  ;;  %v1098_v21 = vpack.c.bf16 %v144_v56, %v137_v52  ;;  %v153_v22 = vand.u32 4294901760, %v152_v9  ;;  %v160_v24 = vand.u32 4294901760, %v159_v10 }
  0x16   :  { %1012 = vmatpush3.bf16.msra.mxu1 %v1281_v32  ;;  %1084 = vmatpush3.bf16.msra.mxu0 %v1281_v32  ;;  %v179_v25 = vand.u32 4294901760, %v1369_v4  ;;  %v1026_v26 = vpack.c.bf16 %v146_v15, %v139_v8  ;;  %v166_v45 = vsub.f32 %v1349_v57, %v165_v16  ;;  %v173_v27 = vsub.f32 %v1351_v58, %v172_v17 }
  0x17   :  { %1013 = vmatprep.subr.bf16.mxu1 %v1179_v3  ;;  %1085 = vmatprep.subr.bf16.mxu0 %v1179_v3  ;;  %v186_v33 = vand.u32 4294901760, %v1372_v5  ;;  %v1401_v28 = vsub.f32 %v1288_v35, %v66_v39  ;;  %v1406_v34 = vsub.f32 %v1295_v36, %v69_v42  ;;  %v1029_v46 = vpack.c.bf16 %v160_v24, %v153_v22 }
  0x18   :  { %v180_v52 = vsub.f32 %v1369_v4, %v179_v25  ;;  %v193_v54 = vand.u32 4294901760, %v1385_v19  ;;  %v167_v35 = vand.u32 4294901760, %v166_v45  ;;  %v174_v39 = vand.u32 4294901760, %v173_v27 }
  0x19   :  { %v187_v55 = vsub.f32 %v1372_v5, %v186_v33  ;;  %v200_v36 = vand.u32 4294901760, %v1390_v20  ;;  %v1421_v42 = vsub.f32 %v1317_v43, %v72_v49  ;;  %v1426_v56 = vsub.f32 %v1322_v44, %v75_v50 }
  0x1a   :  { %1015 = vmatpush3.bf16.msra.mxu1 %v1311_v41  ;;  %1087 = vmatpush3.bf16.msra.mxu0 %v1311_v41  ;;  %v1104_v59 = vpack.c.bf16 %v172_v17, %v165_v16  ;;  %v181_v60 = vand.u32 4294901760, %v180_v52  ;;  %v1032_v0 = vpack.c.bf16 %v174_v39, %v167_v35  ;;  %v214_v43 = vand.u32 4294901760, %v1406_v34 }
  0x1b   :  { %1016 = vmatprep.subr.bf16.mxu1 %v1179_v3  ;;  %1088 = vmatprep.subr.bf16.mxu0 %v1179_v3  ;;  %v188_v1 = vand.u32 4294901760, %v187_v55  ;;  %v201_v2 = vsub.f32 %v1390_v20, %v200_v36  ;;  %v1107_v44 = vpack.c.bf16 %v186_v33, %v179_v25  ;;  %v228_v10 = vand.u32 4294901760, %v1426_v56 }
  0x1c   :  { %v215_v9 = vsub.f32 %v1406_v34, %v214_v43  ;;  %vm670_vm1 = vcmask 261120  }
  0x1d   :  { %v202_v8 = vand.u32 4294901760, %v201_v2  ;;  %v229_v22 = vsub.f32 %v1426_v56, %v228_v10 }
  0x1e   :  { %1018 = vmatpush3.bf16.msra.mxu1 %v1342_v53  ;;  %1090 = vmatpush3.bf16.msra.mxu0 %v1342_v53  ;;  %v216_v17 = vand.u32 4294901760, %v215_v9 }
  0x1f   :  { %1019 = vmatprep.subr.bf16.mxu1 %v1179_v3  ;;  %1091 = vmatprep.subr.bf16.mxu0 %v1179_v3  ;;  %v230_v45 = vand.u32 4294901760, %v229_v22 }
  0x22   :  { %1021 = vmatpush3.bf16.msra.mxu1 %v1363_v63  ;;  %1093 = vmatpush3.bf16.msra.mxu0 %v1363_v63 }
  0x23   :  { %1022 = vmatprep.subr.bf16.mxu1 %v1179_v3  ;;  %1094 = vmatprep.subr.bf16.mxu0 %v1179_v3 }
  0x25   :  { %821 = vmatmul.mubr.f32.vlgmr.msra.gmra.mrb[0].mxu1 %v114_v7  ;;  %926 = vmatmul.mubr.f32.vlgmr.msra.gmra.mrb[0].mxu0 %v112_v51  ;;  %v1101_v51 = vpack.c.bf16 %v158_v62, %v151_v61  ;;  %v194_v61 = vsub.f32 %v1385_v19, %v193_v54  ;;  %v207_v62 = vand.u32 4294901760, %v1401_v28  ;;  %v1035_v7 = vpack.c.bf16 %v188_v1, %v181_v60 }
  0x26   :  { %1024 = vmatpush3.bf16.msra.mxu1 %v1023_v14  ;;  %1096 = vmatpush3.bf16.msra.mxu0 %v1095_v6  ;;  %v221_v6 = vand.u32 4294901760, %v1421_v42  ;;  %v1110_v14 = vpack.c.bf16 %v200_v36, %v193_v54 }
  0x27   :  { %1025 = vmatprep.subr.bf16.mxu1 %v1179_v3  ;;  %1097 = vmatprep.subr.bf16.mxu0 %v1179_v3  ;;  %v195_v49 = vand.u32 4294901760, %v194_v61  ;;  %v208_v50 = vsub.f32 %v1401_v28, %v207_v62  ;;  %v1113_v25 = vpack.c.bf16 %v214_v43, %v207_v62 }
  0x28   :  { %855 = vmatprep.mubr.msk.f32.mxu1 %vm1180_vm0, %v1181_v11  ;;  %960 = vmatprep.mubr.msk.f32.mxu0 %vm1180_vm0, %v1181_v11  ;;  %v1116_v33 = vpack.c.bf16 %v228_v10, %v221_v6 }
  0x29   :  { %v209_v15 = vand.u32 4294901760, %v208_v50  ;;  %v1038_v16 = vpack.c.bf16 %v202_v8, %v195_v49 }
  0x2a   :  { %1027 = vmatpush3.bf16.msra.mxu1 %v1026_v26  ;;  %1099 = vmatpush3.bf16.msra.mxu0 %v1098_v21  ;;  %v222_v21 = vsub.f32 %v1421_v42, %v221_v6 }
  0x2b   :  { %1028 = vmatprep.subr.bf16.mxu1 %v1179_v3  ;;  %1100 = vmatprep.subr.bf16.mxu0 %v1179_v3  ;;  %v1041_v24 = vpack.c.bf16 %v216_v17, %v209_v15 }
  0x2c   :  { %v223_v26 = vand.u32 4294901760, %v222_v21 }
  0x2e   :  { %1030 = vmatpush3.bf16.msra.mxu1 %v1029_v46  ;;  %1102 = vmatpush3.bf16.msra.mxu0 %v1101_v51  ;;  %v1044_v27 = vpack.c.bf16 %v230_v45, %v223_v26  ;;  %v1047_v46 = vpack.c.bf16 %v1277_v31, %v1273_v29  ;;  %v1050_v51 = vpack.c.bf16 %v1299_v38, %v1297_v37 }
  0x2f   :  { %1031 = vmatprep.subr.bf16.mxu1 %v1179_v3  ;;  %1103 = vmatprep.subr.bf16.mxu0 %v1179_v3  ;;  %v1053_v29 = vpack.c.bf16 %v1330_v48, %v1328_v47 }
  0x32   :  { %1033 = vmatpush3.bf16.msra.mxu1 %v1032_v0  ;;  %1105 = vmatpush3.bf16.msra.mxu0 %v1104_v59 }
  0x33   :  { %1034 = vmatprep.subr.bf16.mxu1 %v1179_v3  ;;  %1106 = vmatprep.subr.bf16.mxu0 %v1179_v3 }
  0x36   :  { %1036 = vmatpush3.bf16.msra.mxu1 %v1035_v7  ;;  %1108 = vmatpush3.bf16.msra.mxu0 %v1107_v44 }
  0x37   :  { %1037 = vmatprep.subr.bf16.mxu1 %v1179_v3  ;;  %1109 = vmatprep.subr.bf16.mxu0 %v1179_v3 }
  0x3a   :  { %1039 = vmatpush3.bf16.msra.mxu1 %v1038_v16  ;;  %1111 = vmatpush3.bf16.msra.mxu0 %v1110_v14 }
  0x3b   :  { %1040 = vmatprep.subr.bf16.mxu1 %v1179_v3  ;;  %1112 = vmatprep.subr.bf16.mxu0 %v1179_v3 }
  0x3e   :  { %1042 = vmatpush3.bf16.msra.mxu1 %v1041_v24  ;;  %1114 = vmatpush3.bf16.msra.mxu0 %v1113_v25 }
  0x3f   :  { %1043 = vmatprep.subr.bf16.mxu1 %v1179_v3  ;;  %1115 = vmatprep.subr.bf16.mxu0 %v1179_v3 }
  0x42   :  { %1045 = vmatpush3.bf16.msra.mxu1 %v1044_v27  ;;  %1117 = vmatpush3.bf16.msra.mxu0 %v1116_v33 }
  0x43   :  { %1046 = vmatprep.subr.bf16.mxu1 %v1179_v3  ;;  %1118 = vmatprep.subr.bf16.mxu0 %v1179_v3 }
  0x45   :  { %856 = vmatmul.mubr.f32.vlgmr.msra.gmra.mrb[0].mxu1 %v1275_v30  ;;  %961 = vmatmul.mubr.f32.vlgmr.msra.gmra.mrb[0].mxu0 %v1275_v30 }
  0x46   :  { %1048 = vmatpush3.bf16.msra.mxu1 %v1047_v46  ;;  %1120 = vmatpush3.bf16.msra.mxu0 %v1222_v12  ;;  %v1056_v12 = vpack.c.bf16 %v1351_v58, %v1349_v57 }
  0x47   :  { %1049 = vmatprep.subr.bf16.mxu1 %v1179_v3  ;;  %1121 = vmatprep.subr.bf16.mxu0 %v1179_v3 }
  0x48   :  { %890 = vmatprep.mubr.msk.f32.mxu1 %vm1180_vm0, %v1181_v11  ;;  %995 = vmatprep.mubr.msk.f32.mxu0 %vm1180_vm0, %v1181_v11  ;;  %v1059_v11 = vpack.c.bf16 %v1372_v5, %v1369_v4 }
  0x4a   :  { %1051 = vmatpush3.bf16.msra.mxu1 %v1050_v51  ;;  %1123 = vmatpush3.bf16.msra.mxu0 %v1226_v13  ;;  %v1062_v13 = vpack.c.bf16 %v1390_v20, %v1385_v19 }
  0x4b   :  { %1052 = vmatprep.subr.bf16.mxu1 %v1179_v3  ;;  %1124 = vmatprep.subr.bf16.mxu0 %v1179_v3 }
  0x4e   :  { %1054 = vmatpush3.bf16.msra.mxu1 %v1053_v29  ;;  %1126 = vmatpush3.bf16.msra.mxu0 %v1238_v18  ;;  %v1065_v18 = vpack.c.bf16 %v1406_v34, %v1401_v28 }
  0x4f   :  { %1055 = vmatprep.subr.bf16.mxu1 %v1179_v3  ;;  %1127 = vmatprep.subr.bf16.mxu0 %v1179_v3 }
  0x52   :  { %1057 = vmatpush3.bf16.msra.mxu1 %v1056_v12  ;;  %1129 = vmatpush3.bf16.msra.mxu0 %v1254_v23  ;;  %v1068_v23 = vpack.c.bf16 %v1426_v56, %v1421_v42 }
  0x53   :  { %1058 = vmatprep.subr.bf16.mxu1 %v1179_v3  ;;  %1130 = vmatprep.subr.bf16.mxu0 %v1179_v3 }
  0x56   :  { %1060 = vmatpush3.bf16.msra.mxu1 %v1059_v11  ;;  %1132 = vmatpush3.bf16.msra.mxu0 %v1281_v32 }
  0x57   :  { %1061 = vmatprep.subr.bf16.mxu1 %v1179_v3  ;;  %1133 = vmatprep.subr.bf16.mxu0 %v1179_v3 }
  0x5a   :  { %1063 = vmatpush3.bf16.msra.mxu1 %v1062_v13  ;;  %1135 = vmatpush3.bf16.msra.mxu0 %v1311_v41 }
  0x5b   :  { %1064 = vmatprep.subr.bf16.mxu1 %v1179_v3  ;;  %1136 = vmatprep.subr.bf16.mxu0 %v1179_v3 }
  0x5e   :  { %1066 = vmatpush3.bf16.msra.mxu1 %v1065_v18  ;;  %1138 = vmatpush3.bf16.msra.mxu0 %v1342_v53 }
  0x5f   :  { %1067 = vmatprep.subr.bf16.mxu1 %v1179_v3  ;;  %1139 = vmatprep.subr.bf16.mxu0 %v1179_v3 }
  0x62   :  { %1069 = vmatpush3.bf16.msra.mxu1 %v1068_v23  ;;  %1141 = vmatpush3.bf16.msra.mxu0 %v1363_v63 }
  0x65   :  { %891 = vmatmul.mubr.f32.vlgmr.msra.gmra.mrb[0].mxu1 %v1303_v40  ;;  %996 = vmatmul.mubr.f32.vlgmr.msra.gmra.mrb[0].mxu0 %v1275_v30 }
 0x138   :  { %v371_v31 = vpop.f32.mrb[0].mxu1  ;;  %v666_v32 = vpop.f32.mrb[0].mxu0 }
 0x139   :  { %v1142_v37 = vadd.f32 %v666_v32, %v371_v31  ;;  %v892_v38 = vpop.f32.mrb[1].mxu1  ;;  %v997_v41 = vpop.f32.mrb[1].mxu0 }
 0x13b   :  { %671 = vst.msk [vmem:[#allocation2] sm:$0xff] %vm670_vm1, %v1142_v37 }
 0x13c   :  { %1166 = shalt.err (!%p1163_p4)
}
 0x13d   :  { %s1167_s18 = scalar_lea.hbm %s1510_s2, 128 }
 0x13e   :  { %p1168_p5 = scmp.ne.s32.totalorder %s1510_s2, %s1167_s18  ;;  %p1171_p6 = scmp.lt.u32.totalorder %s1167_s18, %s1510_s2 }
 0x140   :  { %p1173_p7 = pnand %p1171_p6, %p1168_p5 }
 0x142   :  { %1176 = shalt.err (!%p1173_p7)
}
 0x143   :  { %681 = dma.vmem_to_hbm [thread:$0]  %s679_s14, 128, %s1510_s2, [#allocation3]  }
 0x144   :  { %1177 = dma.done.wait [#allocation3], 128  }
 0x145   :  { %1178 = vsyncadd [#allocation3], 4294967168 }
 0x146   :  { %685 = vsyncpa [#allocation3], 1 }

</bundles_post_ra>
